<compile_context>
chip_gen: v7x
topology: tpu7x:2x2x1
jax: 0.10.0
libtpu: 0.0.40
codegen_flags: <defaults>
</compile_context>

<pallas_src>
import math
from functools import partial

import jax
import jax.numpy as jnp
import numpy as np
from jax.experimental import pallas as pl
from jax.experimental.pallas import tpu as pltpu


# ----------------------------- fused kernel -------------------------------- #

def _decoder_kernel(x_ref, w1_ref, b1_ref, w2_ref, b2_ref, wp_ref, bp_ref,
                    wq_ref, bq_ref, wkb_ref, pred_ref, probs_ref,
                    *, num_modes, pred_horizon):
    M = num_modes
    T2 = 2 * pred_horizon
    H = x_ref.shape[-1]

    x = x_ref[...]                                                     # (Np, H)

    # All M first-layer matmuls fused into a single lane-dense MXU op.
    h_all = jnp.dot(x, w1_ref[...], preferred_element_type=jnp.float32) + b1_ref[...]
    h_all = jnp.maximum(h_all, 0.0)                                    # (Np, M*H)

    # GoalAtt projections: q = x@Wq + bq ; A = q @ [wk0 | wk1 | bk]^T -> (Np, 3)
    q = jnp.dot(x, wq_ref[...], preferred_element_type=jnp.float32) + bq_ref[...]
    A = jnp.dot(q, wkb_ref[...], preferred_element_type=jnp.float32)   # (Np, 3)
    a0, a1, a2 = A[:, 0:1], A[:, 1:2], A[:, 2:3]

    preds = []
    score_cols = []
    for m in range(M):                                                 # static unroll (M small)
        h_m = h_all[:, m * H:(m + 1) * H]                              # (Np, H)
        z_m = x + jnp.dot(h_m, w2_ref[m], preferred_element_type=jnp.float32) + b2_ref[m]
        p_m = jnp.dot(z_m, wp_ref[m], preferred_element_type=jnp.float32) + bp_ref[m]
        preds.append(p_m)                                              # (Np, 2T)
        gx = p_m[:, T2 - 2:T2 - 1]                                     # goal x (last step)
        gy = p_m[:, T2 - 1:T2]                                         # goal y (last step)
        score_cols.append(a0 * gx + a1 * gy + a2)                      # (Np, 1)

    # Single lane-dense store of the full trajectory slab.
    pred_ref[...] = jnp.concatenate(preds, axis=-1)                    # (Np, M*2T)

    # Softmax over modes.
    scores = jnp.concatenate(score_cols, axis=-1) * (1.0 / math.sqrt(H))  # (Np, M)
    mx = jnp.max(scores, axis=-1, keepdims=True)
    e = jnp.exp(scores - mx)
    probs_ref[...] = e / jnp.sum(e, axis=-1, keepdims=True)


# ------------------------------- wrapper ------------------------------------ #

def decoder_forward(agt_emb, params, *, num_modes, pred_horizon):
    N, one, H = agt_emb.shape
    assert one == 1, "agt_emb expected as (N, 1, hidden)"
    M, T = num_modes, pred_horizon
    T2 = 2 * T

    x = agt_emb[:, 0, :].astype(jnp.float32)                           # (N, H)
    Np = ((N + 7) // 8) * 8                                            # sublane-align rows
    if Np != N:
        x = jnp.pad(x, ((0, Np - N), (0, 0)))

    # Layout plumbing (weights only): fuse per-mode first layers; pre-pack k_lin.
    w1cat = jnp.transpose(params["w1"], (1, 0, 2)).reshape(H, M * H)   # (H, M*H)
    b1cat = params["b1"][:, 0, :].reshape(1, M * H)                    # (1, M*H)
    wkb = jnp.concatenate([params["wk"], params["bk"]], axis=0).T      # (H, 3)

    kernel = partial(_decoder_kernel, num_modes=M, pred_horizon=T)

    pred_slab, probs_pad = pl.pallas_call(
        kernel,
        out_shape=(
            jax.ShapeDtypeStruct((Np, M * T2), jnp.float32),
            jax.ShapeDtypeStruct((Np, M), jnp.float32),
        ),
        grid=(1,),
        in_specs=[
            pl.BlockSpec((Np, H), lambda i: (0, 0)),
            pl.BlockSpec((H, M * H), lambda i: (0, 0)),
            pl.BlockSpec((1, M * H), lambda i: (0, 0)),
            pl.BlockSpec((M, H, H), lambda i: (0, 0, 0)),
            pl.BlockSpec((M, 1, H), lambda i: (0, 0, 0)),
            pl.BlockSpec((M, H, T2), lambda i: (0, 0, 0)),
            pl.BlockSpec((M, 1, T2), lambda i: (0, 0, 0)),
            pl.BlockSpec((H, H), lambda i: (0, 0)),
            pl.BlockSpec((1, H), lambda i: (0, 0)),
            pl.BlockSpec((H, 3), lambda i: (0, 0)),
        ],
        out_specs=(
            pl.BlockSpec((Np, M * T2), lambda i: (0, 0)),
            pl.BlockSpec((Np, M), lambda i: (0, 0)),
        ),
        compiler_params=pltpu.CompilerParams(
            dimension_semantics=("arbitrary",)),
    )(x, w1cat, b1cat, params["w2"], params["b2"], params["wp"], params["bp"],
      params["wq"], params["bq"], wkb)

    # Reshape slab -> (M, N, T, 2); strip row padding.
    pred = pred_slab[:N].reshape(N, M, T, 2)
    reg = jnp.transpose(pred, (1, 0, 2, 3))
    probs = probs_pad[:N]
    # TODO(synk): training would need a custom VJP; .detach() on goals is gradient-only.
    return reg, probs


# ----------------------- deterministic params ------------------------------ #

def init_params(key, hidden_size, num_modes, pred_horizon):
    H, M, T = hidden_size, num_modes, pred_horizon
    ks = jax.random.split(key, 10)

    def u(k, shape, fan_in):
        b = 1.0 / math.sqrt(fan_in)
        return jax.random.uniform(k, shape, jnp.float32, -b, b)

    return dict(
        # per-mode MLP + head (stacked over modes)
        w1=u(ks[0], (M, H, H), H), b1=u(ks[1], (M, 1, H), H),
        w2=u(ks[2], (M, H, H), H), b2=u(ks[3], (M, 1, H), H),
        wp=u(ks[4], (M, H, 2 * T), H), bp=u(ks[5], (M, 1, 2 * T), H),
        # GoalAtt q_lin (H->H) and k_lin (2->H)
        wq=u(ks[6], (H, H), H), bq=u(ks[7], (1, H), H),
        wk=u(ks[8], (2, H), 2), bk=u(ks[9], (1, H), 2),
    )


# ---------------------------- pure-JAX reference ---------------------------- #

def decoder_reference(agt_emb, params, *, num_modes, pred_horizon):
    N, _, H = agt_emb.shape
    M, T = num_modes, pred_horizon
    x = agt_emb[:, 0, :]
    preds = []
    for i in range(M):
        h = jnp.maximum(x @ params["w1"][i] + params["b1"][i, 0], 0.0)
        y = h @ params["w2"][i] + params["b2"][i, 0]
        z = x + y
        p = z @ params["wp"][i] + params["bp"][i, 0]
        preds.append(p.reshape(N, T, 2))
    reg = jnp.stack(preds)
    goals = jnp.transpose(reg[:, :, -1, :], (1, 0, 2))
    q = x @ params["wq"] + params["bq"][0]
    key = jnp.einsum("nmk,kh->nmh", goals, params["wk"]) + params["bk"][0]
    scores = jnp.einsum("nh,nmh->nm", q, key) / math.sqrt(H)
    probs = jax.nn.softmax(scores, axis=-1)
    return reg, probs


# ------------------------------- main --------------------------------------- #

if __name__ == "__main__":
    N, H, M, T = 4, 32, 6, 8   # agents, hidden, num_modes, pred_horizon (small test sizes)

    key = jax.random.PRNGKey(0)
    k_in, k_par = jax.random.split(key)
    agt_emb = jax.random.normal(k_in, (N, 1, H), dtype=jnp.float32)
    params = init_params(k_par, H, M, T)

    reg, probs = decoder_forward(agt_emb, params, num_modes=M, pred_horizon=T)
    jax.block_until_ready(reg)
    jax.block_until_ready(probs)

    reg_ref, probs_ref = decoder_reference(agt_emb, params, num_modes=M, pred_horizon=T)
    np.testing.assert_allclose(np.asarray(reg), np.asarray(reg_ref), rtol=2e-5, atol=2e-5)
    np.testing.assert_allclose(np.asarray(probs), np.asarray(probs_ref), rtol=2e-5, atol=2e-5)
    assert reg.shape == (M, N, T, 2) and probs.shape == (N, M)

    print("KERNEL_OK")
</pallas_src>

<mosaic_0001>
module attributes {stable_mosaic.version = 11 : i64} {
  func.func @_decoder_kernel(%arg0: i32, %arg1: memref<8x32xf32, #tpu.memory_space<vmem>>, %arg2: memref<32x192xf32, #tpu.memory_space<vmem>>, %arg3: memref<1x192xf32, #tpu.memory_space<vmem>>, %arg4: memref<6x32x32xf32, #tpu.memory_space<vmem>>, %arg5: memref<6x1x32xf32, #tpu.memory_space<vmem>>, %arg6: memref<6x32x16xf32, #tpu.memory_space<vmem>>, %arg7: memref<6x1x16xf32, #tpu.memory_space<vmem>>, %arg8: memref<32x32xf32, #tpu.memory_space<vmem>>, %arg9: memref<1x32xf32, #tpu.memory_space<vmem>>, %arg10: memref<32x3xf32, #tpu.memory_space<vmem>>, %arg11: memref<8x96xf32, #tpu.memory_space<vmem>>, %arg12: memref<8x6xf32, #tpu.memory_space<vmem>>) attributes {dimension_semantics = [#tpu.dimension_semantics<arbitrary>], iteration_bounds = array<i64: 1>, scalar_prefetch = 0 : i64, scratch_operands = 0 : i64, tpu.core_type = #tpu.core_type<tc>, window_params = [{pipeline_mode = #tpu.pipeline_mode<synchronous>, transform_indices = @transform_0, window_bounds = array<i64: 8, 32>}, {pipeline_mode = #tpu.pipeline_mode<synchronous>, transform_indices = @transform_1, window_bounds = array<i64: 32, 192>}, {pipeline_mode = #tpu.pipeline_mode<synchronous>, transform_indices = @transform_2, window_bounds = array<i64: 1, 192>}, {pipeline_mode = #tpu.pipeline_mode<synchronous>, transform_indices = @transform_3, window_bounds = array<i64: 6, 32, 32>}, {pipeline_mode = #tpu.pipeline_mode<synchronous>, transform_indices = @transform_4, window_bounds = array<i64: 6, 1, 32>}, {pipeline_mode = #tpu.pipeline_mode<synchronous>, transform_indices = @transform_5, window_bounds = array<i64: 6, 32, 16>}, {pipeline_mode = #tpu.pipeline_mode<synchronous>, transform_indices = @transform_6, window_bounds = array<i64: 6, 1, 16>}, {pipeline_mode = #tpu.pipeline_mode<synchronous>, transform_indices = @transform_7, window_bounds = array<i64: 32, 32>}, {pipeline_mode = #tpu.pipeline_mode<synchronous>, transform_indices = @transform_8, window_bounds = array<i64: 1, 32>}, {pipeline_mode = #tpu.pipeline_mode<synchronous>, transform_indices = @transform_9, window_bounds = array<i64: 32, 3>}, {pipeline_mode = #tpu.pipeline_mode<synchronous>, transform_indices = @transform_10, window_bounds = array<i64: 8, 96>}, {pipeline_mode = #tpu.pipeline_mode<synchronous>, transform_indices = @transform_11, window_bounds = array<i64: 8, 6>}]} {
    %c0 = arith.constant 0 : index
    %c0_0 = arith.constant 0 : index
    %0 = vector.load %arg1[%c0, %c0_0] : memref<8x32xf32, #tpu.memory_space<vmem>>, vector<8x32xf32>
    %c0_1 = arith.constant 0 : index
    %c0_2 = arith.constant 0 : index
    %1 = vector.load %arg2[%c0_1, %c0_2] : memref<32x192xf32, #tpu.memory_space<vmem>>, vector<32x192xf32>
    %cst = arith.constant dense<0.000000e+00> : vector<8x192xf32>
    %2 = tpu.matmul %0, %1, %cst {dimension_numbers = #tpu.dot_dimension_numbers<[1], [0], [0], [1], [0, 0, 1, 1], [], []>} : vector<8x32xf32>, vector<32x192xf32>, vector<8x192xf32> -> vector<8x192xf32>
    %c0_3 = arith.constant 0 : index
    %c0_4 = arith.constant 0 : index
    %3 = vector.load %arg3[%c0_3, %c0_4] : memref<1x192xf32, #tpu.memory_space<vmem>>, vector<1x192xf32>
    %4 = vector.broadcast %3 : vector<1x192xf32> to vector<8x192xf32>
    %5 = arith.addf %2, %4 : vector<8x192xf32>
    %cst_5 = arith.constant 0.000000e+00 : f32
    %6 = vector.broadcast %cst_5 : f32 to vector<8x192xf32>
    %7 = arith.maximumf %5, %6 : vector<8x192xf32>
    %c0_6 = arith.constant 0 : index
    %c0_7 = arith.constant 0 : index
    %8 = vector.load %arg8[%c0_6, %c0_7] : memref<32x32xf32, #tpu.memory_space<vmem>>, vector<32x32xf32>
    %cst_8 = arith.constant dense<0.000000e+00> : vector<8x32xf32>
    %9 = tpu.matmul %0, %8, %cst_8 {dimension_numbers = #tpu.dot_dimension_numbers<[1], [0], [0], [1], [0, 0, 1, 1], [], []>} : vector<8x32xf32>, vector<32x32xf32>, vector<8x32xf32> -> vector<8x32xf32>
    %c0_9 = arith.constant 0 : index
    %c0_10 = arith.constant 0 : index
    %10 = vector.load %arg9[%c0_9, %c0_10] : memref<1x32xf32, #tpu.memory_space<vmem>>, vector<1x32xf32>
    %11 = vector.broadcast %10 : vector<1x32xf32> to vector<8x32xf32>
    %12 = arith.addf %9, %11 : vector<8x32xf32>
    %c0_11 = arith.constant 0 : index
    %c0_12 = arith.constant 0 : index
    %13 = vector.load %arg10[%c0_11, %c0_12] : memref<32x3xf32, #tpu.memory_space<vmem>>, vector<32x3xf32>
    %cst_13 = arith.constant dense<0.000000e+00> : vector<8x3xf32>
    %14 = tpu.matmul %12, %13, %cst_13 {dimension_numbers = #tpu.dot_dimension_numbers<[1], [0], [0], [1], [0, 0, 1, 1], [], []>} : vector<8x32xf32>, vector<32x3xf32>, vector<8x3xf32> -> vector<8x3xf32>
    %15 = vector.extract_strided_slice %14 {offsets = [0, 0], sizes = [8, 1], strides = [1, 1]} : vector<8x3xf32> to vector<8x1xf32>
    %16 = vector.extract_strided_slice %14 {offsets = [0, 1], sizes = [8, 1], strides = [1, 1]} : vector<8x3xf32> to vector<8x1xf32>
    %17 = vector.extract_strided_slice %14 {offsets = [0, 2], sizes = [8, 1], strides = [1, 1]} : vector<8x3xf32> to vector<8x1xf32>
    %18 = vector.extract_strided_slice %7 {offsets = [0, 0], sizes = [8, 32], strides = [1, 1]} : vector<8x192xf32> to vector<8x32xf32>
    %c0_14 = arith.constant 0 : index
    %c0_15 = arith.constant 0 : index
    %c0_16 = arith.constant 0 : index
    %19 = vector.load %arg4[%c0_14, %c0_15, %c0_16] : memref<6x32x32xf32, #tpu.memory_space<vmem>>, vector<1x32x32xf32>
    %20 = vector.shape_cast %19 : vector<1x32x32xf32> to vector<32x32xf32>
    %cst_17 = arith.constant dense<0.000000e+00> : vector<8x32xf32>
    %21 = tpu.matmul %18, %20, %cst_17 {dimension_numbers = #tpu.dot_dimension_numbers<[1], [0], [0], [1], [0, 0, 1, 1], [], []>} : vector<8x32xf32>, vector<32x32xf32>, vector<8x32xf32> -> vector<8x32xf32>
    %22 = arith.addf %0, %21 : vector<8x32xf32>
    %c0_18 = arith.constant 0 : index
    %c0_19 = arith.constant 0 : index
    %c0_20 = arith.constant 0 : index
    %23 = vector.load %arg5[%c0_18, %c0_19, %c0_20] : memref<6x1x32xf32, #tpu.memory_space<vmem>>, vector<1x1x32xf32>
    %24 = vector.shape_cast %23 : vector<1x1x32xf32> to vector<1x32xf32>
    %25 = vector.broadcast %24 : vector<1x32xf32> to vector<8x32xf32>
    %26 = arith.addf %22, %25 : vector<8x32xf32>
    %c0_21 = arith.constant 0 : index
    %c0_22 = arith.constant 0 : index
    %c0_23 = arith.constant 0 : index
    %27 = vector.load %arg6[%c0_21, %c0_22, %c0_23] : memref<6x32x16xf32, #tpu.memory_space<vmem>>, vector<1x32x16xf32>
    %28 = vector.shape_cast %27 : vector<1x32x16xf32> to vector<32x16xf32>
    %cst_24 = arith.constant dense<0.000000e+00> : vector<8x16xf32>
    %29 = tpu.matmul %26, %28, %cst_24 {dimension_numbers = #tpu.dot_dimension_numbers<[1], [0], [0], [1], [0, 0, 1, 1], [], []>} : vector<8x32xf32>, vector<32x16xf32>, vector<8x16xf32> -> vector<8x16xf32>
    %c0_25 = arith.constant 0 : index
    %c0_26 = arith.constant 0 : index
    %c0_27 = arith.constant 0 : index
    %30 = vector.load %arg7[%c0_25, %c0_26, %c0_27] : memref<6x1x16xf32, #tpu.memory_space<vmem>>, vector<1x1x16xf32>
    %31 = vector.shape_cast %30 : vector<1x1x16xf32> to vector<1x16xf32>
    %32 = vector.broadcast %31 : vector<1x16xf32> to vector<8x16xf32>
    %33 = arith.addf %29, %32 : vector<8x16xf32>
    %34 = vector.extract_strided_slice %33 {offsets = [0, 14], sizes = [8, 1], strides = [1, 1]} : vector<8x16xf32> to vector<8x1xf32>
    %35 = vector.extract_strided_slice %33 {offsets = [0, 15], sizes = [8, 1], strides = [1, 1]} : vector<8x16xf32> to vector<8x1xf32>
    %36 = arith.mulf %15, %34 : vector<8x1xf32>
    %37 = arith.mulf %16, %35 : vector<8x1xf32>
    %38 = arith.addf %36, %37 : vector<8x1xf32>
    %39 = arith.addf %38, %17 : vector<8x1xf32>
    %40 = vector.extract_strided_slice %7 {offsets = [0, 32], sizes = [8, 32], strides = [1, 1]} : vector<8x192xf32> to vector<8x32xf32>
    %c1 = arith.constant 1 : index
    %c0_28 = arith.constant 0 : index
    %c0_29 = arith.constant 0 : index
    %41 = vector.load %arg4[%c1, %c0_28, %c0_29] : memref<6x32x32xf32, #tpu.memory_space<vmem>>, vector<1x32x32xf32>
    %42 = vector.shape_cast %41 : vector<1x32x32xf32> to vector<32x32xf32>
    %cst_30 = arith.constant dense<0.000000e+00> : vector<8x32xf32>
    %43 = tpu.matmul %40, %42, %cst_30 {dimension_numbers = #tpu.dot_dimension_numbers<[1], [0], [0], [1], [0, 0, 1, 1], [], []>} : vector<8x32xf32>, vector<32x32xf32>, vector<8x32xf32> -> vector<8x32xf32>
    %44 = arith.addf %0, %43 : vector<8x32xf32>
    %c1_31 = arith.constant 1 : index
    %c0_32 = arith.constant 0 : index
    %c0_33 = arith.constant 0 : index
    %45 = vector.load %arg5[%c1_31, %c0_32, %c0_33] : memref<6x1x32xf32, #tpu.memory_space<vmem>>, vector<1x1x32xf32>
    %46 = vector.shape_cast %45 : vector<1x1x32xf32> to vector<1x32xf32>
    %47 = vector.broadcast %46 : vector<1x32xf32> to vector<8x32xf32>
    %48 = arith.addf %44, %47 : vector<8x32xf32>
    %c1_34 = arith.constant 1 : index
    %c0_35 = arith.constant 0 : index
    %c0_36 = arith.constant 0 : index
    %49 = vector.load %arg6[%c1_34, %c0_35, %c0_36] : memref<6x32x16xf32, #tpu.memory_space<vmem>>, vector<1x32x16xf32>
    %50 = vector.shape_cast %49 : vector<1x32x16xf32> to vector<32x16xf32>
    %cst_37 = arith.constant dense<0.000000e+00> : vector<8x16xf32>
    %51 = tpu.matmul %48, %50, %cst_37 {dimension_numbers = #tpu.dot_dimension_numbers<[1], [0], [0], [1], [0, 0, 1, 1], [], []>} : vector<8x32xf32>, vector<32x16xf32>, vector<8x16xf32> -> vector<8x16xf32>
    %c1_38 = arith.constant 1 : index
    %c0_39 = arith.constant 0 : index
    %c0_40 = arith.constant 0 : index
    %52 = vector.load %arg7[%c1_38, %c0_39, %c0_40] : memref<6x1x16xf32, #tpu.memory_space<vmem>>, vector<1x1x16xf32>
    %53 = vector.shape_cast %52 : vector<1x1x16xf32> to vector<1x16xf32>
    %54 = vector.broadcast %53 : vector<1x16xf32> to vector<8x16xf32>
    %55 = arith.addf %51, %54 : vector<8x16xf32>
    %56 = vector.extract_strided_slice %55 {offsets = [0, 14], sizes = [8, 1], strides = [1, 1]} : vector<8x16xf32> to vector<8x1xf32>
    %57 = vector.extract_strided_slice %55 {offsets = [0, 15], sizes = [8, 1], strides = [1, 1]} : vector<8x16xf32> to vector<8x1xf32>
    %58 = arith.mulf %15, %56 : vector<8x1xf32>
    %59 = arith.mulf %16, %57 : vector<8x1xf32>
    %60 = arith.addf %58, %59 : vector<8x1xf32>
    %61 = arith.addf %60, %17 : vector<8x1xf32>
    %62 = vector.extract_strided_slice %7 {offsets = [0, 64], sizes = [8, 32], strides = [1, 1]} : vector<8x192xf32> to vector<8x32xf32>
    %c2 = arith.constant 2 : index
    %c0_41 = arith.constant 0 : index
    %c0_42 = arith.constant 0 : index
    %63 = vector.load %arg4[%c2, %c0_41, %c0_42] : memref<6x32x32xf32, #tpu.memory_space<vmem>>, vector<1x32x32xf32>
    %64 = vector.shape_cast %63 : vector<1x32x32xf32> to vector<32x32xf32>
    %cst_43 = arith.constant dense<0.000000e+00> : vector<8x32xf32>
    %65 = tpu.matmul %62, %64, %cst_43 {dimension_numbers = #tpu.dot_dimension_numbers<[1], [0], [0], [1], [0, 0, 1, 1], [], []>} : vector<8x32xf32>, vector<32x32xf32>, vector<8x32xf32> -> vector<8x32xf32>
    %66 = arith.addf %0, %65 : vector<8x32xf32>
    %c2_44 = arith.constant 2 : index
    %c0_45 = arith.constant 0 : index
    %c0_46 = arith.constant 0 : index
    %67 = vector.load %arg5[%c2_44, %c0_45, %c0_46] : memref<6x1x32xf32, #tpu.memory_space<vmem>>, vector<1x1x32xf32>
    %68 = vector.shape_cast %67 : vector<1x1x32xf32> to vector<1x32xf32>
    %69 = vector.broadcast %68 : vector<1x32xf32> to vector<8x32xf32>
    %70 = arith.addf %66, %69 : vector<8x32xf32>
    %c2_47 = arith.constant 2 : index
    %c0_48 = arith.constant 0 : index
    %c0_49 = arith.constant 0 : index
    %71 = vector.load %arg6[%c2_47, %c0_48, %c0_49] : memref<6x32x16xf32, #tpu.memory_space<vmem>>, vector<1x32x16xf32>
    %72 = vector.shape_cast %71 : vector<1x32x16xf32> to vector<32x16xf32>
    %cst_50 = arith.constant dense<0.000000e+00> : vector<8x16xf32>
    %73 = tpu.matmul %70, %72, %cst_50 {dimension_numbers = #tpu.dot_dimension_numbers<[1], [0], [0], [1], [0, 0, 1, 1], [], []>} : vector<8x32xf32>, vector<32x16xf32>, vector<8x16xf32> -> vector<8x16xf32>
    %c2_51 = arith.constant 2 : index
    %c0_52 = arith.constant 0 : index
    %c0_53 = arith.constant 0 : index
    %74 = vector.load %arg7[%c2_51, %c0_52, %c0_53] : memref<6x1x16xf32, #tpu.memory_space<vmem>>, vector<1x1x16xf32>
    %75 = vector.shape_cast %74 : vector<1x1x16xf32> to vector<1x16xf32>
    %76 = vector.broadcast %75 : vector<1x16xf32> to vector<8x16xf32>
    %77 = arith.addf %73, %76 : vector<8x16xf32>
    %78 = vector.extract_strided_slice %77 {offsets = [0, 14], sizes = [8, 1], strides = [1, 1]} : vector<8x16xf32> to vector<8x1xf32>
    %79 = vector.extract_strided_slice %77 {offsets = [0, 15], sizes = [8, 1], strides = [1, 1]} : vector<8x16xf32> to vector<8x1xf32>
    %80 = arith.mulf %15, %78 : vector<8x1xf32>
    %81 = arith.mulf %16, %79 : vector<8x1xf32>
    %82 = arith.addf %80, %81 : vector<8x1xf32>
    %83 = arith.addf %82, %17 : vector<8x1xf32>
    %84 = vector.extract_strided_slice %7 {offsets = [0, 96], sizes = [8, 32], strides = [1, 1]} : vector<8x192xf32> to vector<8x32xf32>
    %c3 = arith.constant 3 : index
    %c0_54 = arith.constant 0 : index
    %c0_55 = arith.constant 0 : index
    %85 = vector.load %arg4[%c3, %c0_54, %c0_55] : memref<6x32x32xf32, #tpu.memory_space<vmem>>, vector<1x32x32xf32>
    %86 = vector.shape_cast %85 : vector<1x32x32xf32> to vector<32x32xf32>
    %cst_56 = arith.constant dense<0.000000e+00> : vector<8x32xf32>
    %87 = tpu.matmul %84, %86, %cst_56 {dimension_numbers = #tpu.dot_dimension_numbers<[1], [0], [0], [1], [0, 0, 1, 1], [], []>} : vector<8x32xf32>, vector<32x32xf32>, vector<8x32xf32> -> vector<8x32xf32>
    %88 = arith.addf %0, %87 : vector<8x32xf32>
    %c3_57 = arith.constant 3 : index
    %c0_58 = arith.constant 0 : index
    %c0_59 = arith.constant 0 : index
    %89 = vector.load %arg5[%c3_57, %c0_58, %c0_59] : memref<6x1x32xf32, #tpu.memory_space<vmem>>, vector<1x1x32xf32>
    %90 = vector.shape_cast %89 : vector<1x1x32xf32> to vector<1x32xf32>
    %91 = vector.broadcast %90 : vector<1x32xf32> to vector<8x32xf32>
    %92 = arith.addf %88, %91 : vector<8x32xf32>
    %c3_60 = arith.constant 3 : index
    %c0_61 = arith.constant 0 : index
    %c0_62 = arith.constant 0 : index
    %93 = vector.load %arg6[%c3_60, %c0_61, %c0_62] : memref<6x32x16xf32, #tpu.memory_space<vmem>>, vector<1x32x16xf32>
    %94 = vector.shape_cast %93 : vector<1x32x16xf32> to vector<32x16xf32>
    %cst_63 = arith.constant dense<0.000000e+00> : vector<8x16xf32>
    %95 = tpu.matmul %92, %94, %cst_63 {dimension_numbers = #tpu.dot_dimension_numbers<[1], [0], [0], [1], [0, 0, 1, 1], [], []>} : vector<8x32xf32>, vector<32x16xf32>, vector<8x16xf32> -> vector<8x16xf32>
    %c3_64 = arith.constant 3 : index
    %c0_65 = arith.constant 0 : index
    %c0_66 = arith.constant 0 : index
    %96 = vector.load %arg7[%c3_64, %c0_65, %c0_66] : memref<6x1x16xf32, #tpu.memory_space<vmem>>, vector<1x1x16xf32>
    %97 = vector.shape_cast %96 : vector<1x1x16xf32> to vector<1x16xf32>
    %98 = vector.broadcast %97 : vector<1x16xf32> to vector<8x16xf32>
    %99 = arith.addf %95, %98 : vector<8x16xf32>
    %100 = vector.extract_strided_slice %99 {offsets = [0, 14], sizes = [8, 1], strides = [1, 1]} : vector<8x16xf32> to vector<8x1xf32>
    %101 = vector.extract_strided_slice %99 {offsets = [0, 15], sizes = [8, 1], strides = [1, 1]} : vector<8x16xf32> to vector<8x1xf32>
    %102 = arith.mulf %15, %100 : vector<8x1xf32>
    %103 = arith.mulf %16, %101 : vector<8x1xf32>
    %104 = arith.addf %102, %103 : vector<8x1xf32>
    %105 = arith.addf %104, %17 : vector<8x1xf32>
    %106 = vector.extract_strided_slice %7 {offsets = [0, 128], sizes = [8, 32], strides = [1, 1]} : vector<8x192xf32> to vector<8x32xf32>
    %c4 = arith.constant 4 : index
    %c0_67 = arith.constant 0 : index
    %c0_68 = arith.constant 0 : index
    %107 = vector.load %arg4[%c4, %c0_67, %c0_68] : memref<6x32x32xf32, #tpu.memory_space<vmem>>, vector<1x32x32xf32>
    %108 = vector.shape_cast %107 : vector<1x32x32xf32> to vector<32x32xf32>
    %cst_69 = arith.constant dense<0.000000e+00> : vector<8x32xf32>
    %109 = tpu.matmul %106, %108, %cst_69 {dimension_numbers = #tpu.dot_dimension_numbers<[1], [0], [0], [1], [0, 0, 1, 1], [], []>} : vector<8x32xf32>, vector<32x32xf32>, vector<8x32xf32> -> vector<8x32xf32>
    %110 = arith.addf %0, %109 : vector<8x32xf32>
    %c4_70 = arith.constant 4 : index
    %c0_71 = arith.constant 0 : index
    %c0_72 = arith.constant 0 : index
    %111 = vector.load %arg5[%c4_70, %c0_71, %c0_72] : memref<6x1x32xf32, #tpu.memory_space<vmem>>, vector<1x1x32xf32>
    %112 = vector.shape_cast %111 : vector<1x1x32xf32> to vector<1x32xf32>
    %113 = vector.broadcast %112 : vector<1x32xf32> to vector<8x32xf32>
    %114 = arith.addf %110, %113 : vector<8x32xf32>
    %c4_73 = arith.constant 4 : index
    %c0_74 = arith.constant 0 : index
    %c0_75 = arith.constant 0 : index
    %115 = vector.load %arg6[%c4_73, %c0_74, %c0_75] : memref<6x32x16xf32, #tpu.memory_space<vmem>>, vector<1x32x16xf32>
    %116 = vector.shape_cast %115 : vector<1x32x16xf32> to vector<32x16xf32>
    %cst_76 = arith.constant dense<0.000000e+00> : vector<8x16xf32>
    %117 = tpu.matmul %114, %116, %cst_76 {dimension_numbers = #tpu.dot_dimension_numbers<[1], [0], [0], [1], [0, 0, 1, 1], [], []>} : vector<8x32xf32>, vector<32x16xf32>, vector<8x16xf32> -> vector<8x16xf32>
    %c4_77 = arith.constant 4 : index
    %c0_78 = arith.constant 0 : index
    %c0_79 = arith.constant 0 : index
    %118 = vector.load %arg7[%c4_77, %c0_78, %c0_79] : memref<6x1x16xf32, #tpu.memory_space<vmem>>, vector<1x1x16xf32>
    %119 = vector.shape_cast %118 : vector<1x1x16xf32> to vector<1x16xf32>
    %120 = vector.broadcast %119 : vector<1x16xf32> to vector<8x16xf32>
    %121 = arith.addf %117, %120 : vector<8x16xf32>
    %122 = vector.extract_strided_slice %121 {offsets = [0, 14], sizes = [8, 1], strides = [1, 1]} : vector<8x16xf32> to vector<8x1xf32>
    %123 = vector.extract_strided_slice %121 {offsets = [0, 15], sizes = [8, 1], strides = [1, 1]} : vector<8x16xf32> to vector<8x1xf32>
    %124 = arith.mulf %15, %122 : vector<8x1xf32>
    %125 = arith.mulf %16, %123 : vector<8x1xf32>
    %126 = arith.addf %124, %125 : vector<8x1xf32>
    %127 = arith.addf %126, %17 : vector<8x1xf32>
    %128 = vector.extract_strided_slice %7 {offsets = [0, 160], sizes = [8, 32], strides = [1, 1]} : vector<8x192xf32> to vector<8x32xf32>
    %c5 = arith.constant 5 : index
    %c0_80 = arith.constant 0 : index
    %c0_81 = arith.constant 0 : index
    %129 = vector.load %arg4[%c5, %c0_80, %c0_81] : memref<6x32x32xf32, #tpu.memory_space<vmem>>, vector<1x32x32xf32>
    %130 = vector.shape_cast %129 : vector<1x32x32xf32> to vector<32x32xf32>
    %cst_82 = arith.constant dense<0.000000e+00> : vector<8x32xf32>
    %131 = tpu.matmul %128, %130, %cst_82 {dimension_numbers = #tpu.dot_dimension_numbers<[1], [0], [0], [1], [0, 0, 1, 1], [], []>} : vector<8x32xf32>, vector<32x32xf32>, vector<8x32xf32> -> vector<8x32xf32>
    %132 = arith.addf %0, %131 : vector<8x32xf32>
    %c5_83 = arith.constant 5 : index
    %c0_84 = arith.constant 0 : index
    %c0_85 = arith.constant 0 : index
    %133 = vector.load %arg5[%c5_83, %c0_84, %c0_85] : memref<6x1x32xf32, #tpu.memory_space<vmem>>, vector<1x1x32xf32>
    %134 = vector.shape_cast %133 : vector<1x1x32xf32> to vector<1x32xf32>
    %135 = vector.broadcast %134 : vector<1x32xf32> to vector<8x32xf32>
    %136 = arith.addf %132, %135 : vector<8x32xf32>
    %c5_86 = arith.constant 5 : index
    %c0_87 = arith.constant 0 : index
    %c0_88 = arith.constant 0 : index
    %137 = vector.load %arg6[%c5_86, %c0_87, %c0_88] : memref<6x32x16xf32, #tpu.memory_space<vmem>>, vector<1x32x16xf32>
    %138 = vector.shape_cast %137 : vector<1x32x16xf32> to vector<32x16xf32>
    %cst_89 = arith.constant dense<0.000000e+00> : vector<8x16xf32>
    %139 = tpu.matmul %136, %138, %cst_89 {dimension_numbers = #tpu.dot_dimension_numbers<[1], [0], [0], [1], [0, 0, 1, 1], [], []>} : vector<8x32xf32>, vector<32x16xf32>, vector<8x16xf32> -> vector<8x16xf32>
    %c5_90 = arith.constant 5 : index
    %c0_91 = arith.constant 0 : index
    %c0_92 = arith.constant 0 : index
    %140 = vector.load %arg7[%c5_90, %c0_91, %c0_92] : memref<6x1x16xf32, #tpu.memory_space<vmem>>, vector<1x1x16xf32>
    %141 = vector.shape_cast %140 : vector<1x1x16xf32> to vector<1x16xf32>
    %142 = vector.broadcast %141 : vector<1x16xf32> to vector<8x16xf32>
    %143 = arith.addf %139, %142 : vector<8x16xf32>
    %144 = vector.extract_strided_slice %143 {offsets = [0, 14], sizes = [8, 1], strides = [1, 1]} : vector<8x16xf32> to vector<8x1xf32>
    %145 = vector.extract_strided_slice %143 {offsets = [0, 15], sizes = [8, 1], strides = [1, 1]} : vector<8x16xf32> to vector<8x1xf32>
    %146 = arith.mulf %15, %144 : vector<8x1xf32>
    %147 = arith.mulf %16, %145 : vector<8x1xf32>
    %148 = arith.addf %146, %147 : vector<8x1xf32>
    %149 = arith.addf %148, %17 : vector<8x1xf32>
    %150 = tpu.concatenate %33, %55, %77, %99, %121, %143 in 1 : vector<8x16xf32>, vector<8x16xf32>, vector<8x16xf32>, vector<8x16xf32>, vector<8x16xf32>, vector<8x16xf32> -> vector<8x96xf32>
    %c0_93 = arith.constant 0 : index
    %c0_94 = arith.constant 0 : index
    %151 = vector.load %arg11[%c0_93, %c0_94] : memref<8x96xf32, #tpu.memory_space<vmem>>, vector<8x96xf32>
    tpu.vector_store %arg11[%c0_93, %c0_94], %150 {strides = array<i32>} : memref<8x96xf32, #tpu.memory_space<vmem>>, vector<8x96xf32>,
    %152 = tpu.concatenate %39, %61, %83, %105, %127, %149 in 1 : vector<8x1xf32>, vector<8x1xf32>, vector<8x1xf32>, vector<8x1xf32>, vector<8x1xf32>, vector<8x1xf32> -> vector<8x6xf32>
    %cst_95 = arith.constant 0.176776692 : f32
    %153 = vector.broadcast %cst_95 : f32 to vector<8x6xf32>
    %154 = arith.mulf %152, %153 : vector<8x6xf32>
    %cst_96 = arith.constant dense<0xFF800000> : vector<8xf32>
    %155 = vector.multi_reduction <maximumf>, %154, %cst_96 [1] : vector<8x6xf32> to vector<8xf32>
    %156 = vector.shape_cast %155 : vector<8xf32> to vector<8x1xf32>
    %157 = vector.broadcast %156 : vector<8x1xf32> to vector<8x6xf32>
    %158 = arith.subf %154, %157 : vector<8x6xf32>
    %159 = math.exp %158 : vector<8x6xf32>
    %cst_97 = arith.constant dense<0.000000e+00> : vector<8xf32>
    %160 = vector.multi_reduction <add>, %159, %cst_97 [1] : vector<8x6xf32> to vector<8xf32>
    %161 = vector.shape_cast %160 : vector<8xf32> to vector<8x1xf32>
    %162 = vector.broadcast %161 : vector<8x1xf32> to vector<8x6xf32>
    %163 = arith.divf %159, %162 : vector<8x6xf32>
    %c0_98 = arith.constant 0 : index
    %c0_99 = arith.constant 0 : index
    %164 = vector.load %arg12[%c0_98, %c0_99] : memref<8x6xf32, #tpu.memory_space<vmem>>, vector<8x6xf32>
    tpu.vector_store %arg12[%c0_98, %c0_99], %163 {strides = array<i32>} : memref<8x6xf32, #tpu.memory_space<vmem>>, vector<8x6xf32>,
    return
  }
  func.func @transform_0(%arg0: i32) -> (i32, i32) {
    %c0_i32 = arith.constant 0 : i32
    %c0_i32_0 = arith.constant 0 : i32
    %c0_i32_1 = arith.constant 0 : i32
    return %c0_i32, %c0_i32_0 : i32, i32
  }
  func.func @transform_1(%arg0: i32) -> (i32, i32) {
    %c0_i32 = arith.constant 0 : i32
    %c0_i32_0 = arith.constant 0 : i32
    %c0_i32_1 = arith.constant 0 : i32
    return %c0_i32, %c0_i32_0 : i32, i32
  }
  func.func @transform_2(%arg0: i32) -> (i32, i32) {
    %c0_i32 = arith.constant 0 : i32
    %c0_i32_0 = arith.constant 0 : i32
    %c0_i32_1 = arith.constant 0 : i32
    return %c0_i32, %c0_i32_0 : i32, i32
  }
  func.func @transform_3(%arg0: i32) -> (i32, i32, i32) {
    %c0_i32 = arith.constant 0 : i32
    %c0_i32_0 = arith.constant 0 : i32
    %c0_i32_1 = arith.constant 0 : i32
    %c0_i32_2 = arith.constant 0 : i32
    return %c0_i32, %c0_i32_0, %c0_i32_1 : i32, i32, i32
  }
  func.func @transform_4(%arg0: i32) -> (i32, i32, i32) {
    %c0_i32 = arith.constant 0 : i32
    %c0_i32_0 = arith.constant 0 : i32
    %c0_i32_1 = arith.constant 0 : i32
    %c0_i32_2 = arith.constant 0 : i32
    return %c0_i32, %c0_i32_0, %c0_i32_1 : i32, i32, i32
  }
  func.func @transform_5(%arg0: i32) -> (i32, i32, i32) {
    %c0_i32 = arith.constant 0 : i32
    %c0_i32_0 = arith.constant 0 : i32
    %c0_i32_1 = arith.constant 0 : i32
    %c0_i32_2 = arith.constant 0 : i32
    return %c0_i32, %c0_i32_0, %c0_i32_1 : i32, i32, i32
  }
  func.func @transform_6(%arg0: i32) -> (i32, i32, i32) {
    %c0_i32 = arith.constant 0 : i32
    %c0_i32_0 = arith.constant 0 : i32
    %c0_i32_1 = arith.constant 0 : i32
    %c0_i32_2 = arith.constant 0 : i32
    return %c0_i32, %c0_i32_0, %c0_i32_1 : i32, i32, i32
  }
  func.func @transform_7(%arg0: i32) -> (i32, i32) {
    %c0_i32 = arith.constant 0 : i32
    %c0_i32_0 = arith.constant 0 : i32
    %c0_i32_1 = arith.constant 0 : i32
    return %c0_i32, %c0_i32_0 : i32, i32
  }
  func.func @transform_8(%arg0: i32) -> (i32, i32) {
    %c0_i32 = arith.constant 0 : i32
    %c0_i32_0 = arith.constant 0 : i32
    %c0_i32_1 = arith.constant 0 : i32
    return %c0_i32, %c0_i32_0 : i32, i32
  }
  func.func @transform_9(%arg0: i32) -> (i32, i32) {
    %c0_i32 = arith.constant 0 : i32
    %c0_i32_0 = arith.constant 0 : i32
    %c0_i32_1 = arith.constant 0 : i32
    return %c0_i32, %c0_i32_0 : i32, i32
  }
  func.func @transform_10(%arg0: i32) -> (i32, i32) {
    %c0_i32 = arith.constant 0 : i32
    %c0_i32_0 = arith.constant 0 : i32
    %c0_i32_1 = arith.constant 0 : i32
    return %c0_i32, %c0_i32_0 : i32, i32
  }
  func.func @transform_11(%arg0: i32) -> (i32, i32) {
    %c0_i32 = arith.constant 0 : i32
    %c0_i32_0 = arith.constant 0 : i32
    %c0_i32_1 = arith.constant 0 : i32
    return %c0_i32, %c0_i32_0 : i32, i32
  }
}

</mosaic_0001>

<bundles_post_ra>
// kernel: tpu_custom_call.1
= control target key start
LH: loop header
LB: loop body
LE: loop exit
PB: predicated region body
PF: predicated region fallthrough
CT: control target
= control target key end

     0   :  { %17 = vsyncpa [#allocation3], 0  ;;  %v1972_v7 = vmov 0.0   ;;  %v1973_v8 = vmov 0.0|0.0   ;;  %vm1974_vm0 = vmmov 0   ;;  %s2442_s0 = inlined_call_operand.vmem [shape: f32[8,32], index: 0, kind: input, shape index: {}]   ;;  %s2443_s1 = inlined_call_operand.vmem [shape: f32[32,192], index: 1, kind: input, shape index: {}]   ;;  %s2444_s2 = inlined_call_operand.vmem [shape: f32[1,192], index: 2, kind: input, shape index: {}]   ;;  %s2445_s3 = inlined_call_operand.vmem [shape: f32[6,32,32], index: 3, kind: input, shape index: {}]   ;;  %s2446_s4 = inlined_call_operand.vmem [shape: f32[6,1,32], index: 4, kind: input, shape index: {}]   ;;  %s2447_s5 = inlined_call_operand.vmem [shape: f32[6,32,16], index: 5, kind: input, shape index: {}]   ;;  %s2448_s6 = inlined_call_operand.vmem [shape: f32[6,1,16], index: 6, kind: input, shape index: {}]   ;;  %s2449_s7 = inlined_call_operand.vmem [shape: f32[32,32], index: 7, kind: input, shape index: {}]   ;;  %s2450_s8 = inlined_call_operand.vmem [shape: f32[1,32], index: 8, kind: input, shape index: {}]   ;;  %s2451_s9 = inlined_call_operand.vmem [shape: f32[32,3], index: 9, kind: input, shape index: {}]   ;;  %s2452_s10 = inlined_call_operand.hbm [shape: f32[8,96], index: 10, kind: output, shape index: {0}]   ;;  %s2453_s11 = inlined_call_operand.hbm [shape: f32[8,6], index: 11, kind: output, shape index: {1}]  }
   0x1   :  { %v41_v0 = vld [vmem:[%s2443_s1 + $0x8] sm:$0xff]  ;;  %v43_v1 = vld [vmem:[%s2443_s1 + $0x18] sm:$0xff]  ;;  %v40_v2 = vld [vmem:[%s2443_s1] sm:$0xff]  ;;  %128 = vmatprep.mubr.f32.mxu0 %v1972_v7  ;;  %1817 = vmatprep.subr.bf16.mxu1 %v1973_v8 }
   0x2   :  { %v1809_v3 = vpack.c.bf16 %v43_v1, %v41_v0  ;;  %v42_v4 = vld [vmem:[%s2443_s1 + $0x10] sm:$0xff]  ;;  %v45_v5 = vld [vmem:[%s2443_s1 + $0x28] sm:$0xff]  ;;  %v47_v6 = vld [vmem:[%s2443_s1 + $0x38] sm:$0xff]  ;;  %1663 = vmatprep.mubr.msk.f32.mxu1 %vm1974_vm0, %v1972_v7 }
   0x3   :  { %v1811_v9 = vpack.c.bf16 %v42_v4, %v40_v2  ;;  %v1813_v10 = vpack.c.bf16 %v47_v6, %v45_v5  ;;  %v44_v11 = vld [vmem:[%s2443_s1 + $0x20] sm:$0xff]  ;;  %v46_v12 = vld [vmem:[%s2443_s1 + $0x30] sm:$0xff]  ;;  %v138_v14 = vld [vmem:[%s2449_s7 + $0x8] sm:$0xff] }
   0x4   :  { %1810 = vmatprep.subr.bf16.mxu0 %v1809_v3  ;;  %v137_v13 = vld [vmem:[%s2449_s7] sm:$0xff]  ;;  %v139_v15 = vld [vmem:[%s2449_s7 + $0x10] sm:$0xff]  ;;  %v1815_v16 = vpack.c.bf16 %v46_v12, %v44_v11  ;;  %v140_v18 = vld [vmem:[%s2449_s7 + $0x18] sm:$0xff] }
   0x5   :  { %1812 = vmatpush1.bf16.msra.mxu0 %v1811_v9  ;;  %v1818_v17 = vpack.c.bf16 %v138_v14, %v137_v13 }
   0x6   :  { %1814 = vmatprep.subr.bf16.mxu0 %v1813_v10 }
   0x7   :  { %18 = vsyncpa [#allocation5], 0  ;;  %1819 = vmatpush3.bf16.msra.mxu1 %v1818_v17  ;;  %v1821_v19 = vpack.c.bf16 %v140_v18, %v139_v15  ;;  %v295_v20 = vld [vmem:[%s2445_s3] sm:$0xff]  ;;  %v296_v21 = vld [vmem:[%s2445_s3 + $0x8] sm:$0xff]  ;;  %vm60_vm1 = vcmask 261120   ;;  %v50_v27 = vlaneseq  ;;  %s1975_s19 = smov 32  }
   0x8   :  { %1820 = vmatprep.subr.bf16.mxu1 %v1973_v8  ;;  %v2101_v22 = vld [vmem:[%s2442_s0] sm:$0xff]  ;;  %v1830_v23 = vpack.c.bf16 %v296_v21, %v295_v20  ;;  %v297_v24 = vld [vmem:[%s2445_s3 + $0x10] sm:$0xff]  ;;  %v298_v25 = vld [vmem:[%s2445_s3 + $0x18] sm:$0xff]  ;;  %s1976_s1 = smov 96   ;;  %s1977_s20 = smov 64   ;;  %vm1455_vm2 = vcmask 7168  }
   0x9   :  { %1816 = vmatpush1.bf16.msra.mxu0 %v1815_v16  ;;  %v1833_v26 = vpack.c.bf16 %v298_v25, %v297_v24  ;;  %v51_v28 = vshrl.u32 %v50_v27, 7  ;;  %v48_v30 = vld [vmem:[%s2444_s2] sm:$0x3]  ;;  %v1516_v36 = vld [vmem:[%s2445_s3 + $0x28] sm:$0xff]  ;;  %v1517_v42 = vld [vmem:[%s2445_s3 + $0x30] sm:$0xff]  ;;  %s1978_s27 = smov 114  }
   0xa   :  { %1823 = vmatprep.subr.bf16.mxu0 %v1973_v8  ;;  %v1515_v35 = vld [vmem:[%s2445_s3 + $0x20] sm:$0xff]  ;;  %v1518_v43 = vld [vmem:[%s2445_s3 + $0x38] sm:$0xff]  ;;  %v219_v47 = vld [vmem:[%s2451_s9 + $0x8] sm:$0xff]  ;;  %s1979_s16 = smov 126   ;;  %s1980_s2 = smov 127   ;;  %vm1457_vm3 = vcmask 15360  }
   0xb   :  { %1822 = vmatpush3.bf16.msra.mxu1 %v1821_v19  ;;  %v52_v29 = vsub.s32 0, %v51_v28  ;;  %v56_v31 = vsub.s32 1, %v51_v28  ;;  %v1842_v41 = vpack.c.bf16 %v1516_v36, %v1515_v35  ;;  %v1845_v45 = vpack.c.bf16 %v1518_v43, %v1517_v42  ;;  %v218_v46 = vld [vmem:[%s2451_s9] sm:$0xff]  ;;  %v220_v48 = vld [vmem:[%s2451_s9 + $0x10] sm:$0xff]  ;;  %v221_v51 = vld [vmem:[%s2451_s9 + $0x18] sm:$0xff]  ;;  %s1982_s17 = smov 2  }
   0xc   :  { %1507 = vmatmul.mubr.msk.f32.vlgmr.msra.gmra.mrb[0].mxu0 %vm60_vm1, %v2101_v22  ;;  %1829 = vmatprep.subr.bf16.mxu1 %v1973_v8  ;;  %v1824_v50 = vpack.c.bf16 %v219_v47, %v218_v46  ;;  %v1827_v53 = vpack.c.bf16 %v221_v51, %v220_v48  ;;  %v1508_v54 = vld [vmem:[%s2450_s8] ss:$0 sm:$0xff]  ;;  %v382_v56 = vld [vmem:[%s2447_s5 + $0x8] sm:$0xff]  ;;  %v383_v59 = vld [vmem:[%s2447_s5 + $0x10] sm:$0xff]  ;;  %s1983_s18 = smov 3   ;;  %s1985_s21 = smov 5  }
   0xd   :  { %1674 = vmatprep.mubr.msk.f32.mxu0 %vm1974_vm0, %v1972_v7  ;;  %v53_v32 = vrot.slane %v48_v30, %v52_v29  ;;  %v57_v33 = vrot.slane %v48_v30, %v56_v31  ;;  %v381_v55 = vld [vmem:[%s2447_s5] sm:$0xff]  ;;  %v384_v60 = vld [vmem:[%s2447_s5 + $0x18] sm:$0xff]  ;;  %v1530_v63 = vld [vmem:[%s2445_s3 + $0x48] sm:$0xff]  ;;  %vm1459_vm4 = vcmask 23552   ;;  %vm1461_vm5 = vcmask 31744   ;;  %s1987_s22 = smov 48  }
   0xe   :  { %1664 = vmatmul.mubr.msk.f32.vlgmr.msra.gmra.mrb[0].mxu1 %vm60_vm1, %v2101_v22  ;;  %1825 = vmatpush3.bf16.msra.mxu0 %v1824_v50  ;;  %v1836_v58 = vpack.c.bf16 %v382_v56, %v381_v55  ;;  %v1839_v61 = vpack.c.bf16 %v384_v60, %v383_v59  ;;  %v1529_v62 = vld [vmem:[%s2445_s3 + $0x40] sm:$0xff]  ;;  %v1531_v1 = vld [vmem:[%s2445_s3 + $0x50] sm:$0xff]  ;;  %v1532_v2 = vld [vmem:[%s2445_s3 + $0x58] sm:$0xff]  ;;  %vm1463_vm6 = vcmask 39936   ;;  %vm1466_vm7 = vcmask 48128   ;;  %s1988_s23 = smov 80  }
   0xf   :  { %1831 = vmatpush3.bf16.msra.mxu1 %v1830_v23  ;;  %1685 = vmatprep.mubr.msk.f32.mxu1 %vm1974_vm0, %v1972_v7  ;;  %v1854_v0 = vpack.c.bf16 %v1530_v63, %v1529_v62  ;;  %v1857_v4 = vpack.c.bf16 %v1532_v2, %v1531_v1  ;;  %v1543_v5 = vld [vmem:[%s2445_s3 + $0x60] sm:$0xff]  ;;  %v1544_v6 = vld [vmem:[%s2445_s3 + $0x68] sm:$0xff]  ;;  %v1545_v10 = vld [vmem:[%s2445_s3 + $0x70] sm:$0xff]  ;;  %vm1424_vm8 = vcmask 130048   ;;  %vm1427_vm9 = vcmask 392192   ;;  %s1989_s24 = smov [#allocation2]  }
  0x10   :  { %1832 = vmatprep.subr.bf16.mxu1 %v1973_v8  ;;  %1826 = vmatprep.subr.bf16.mxu0 %v1973_v8  ;;  %v1866_v9 = vpack.c.bf16 %v1544_v6, %v1543_v5  ;;  %v1546_v11 = vld [vmem:[%s2445_s3 + $0x78] sm:$0xff]  ;;  %v1557_v14 = vld [vmem:[%s2445_s3 + $0x80] sm:$0xff]  ;;  %v1558_v15 = vld [vmem:[%s2445_s3 + $0x88] sm:$0xff]  ;;  %vm1429_vm10 = vcmask 523264   ;;  %s1485_s25 = sshll.u32 %s1989_s24, 4  ;;  %vm1431_vm11 = vcmask 654336   ;;  %s1486_s25 = int_to_ptr.vmem [resolvable:$true] %s1485_s25 }
  0x11   :  { %v1869_v13 = vpack.c.bf16 %v1546_v11, %v1545_v10  ;;  %v1878_v16 = vpack.c.bf16 %v1558_v15, %v1557_v14  ;;  %v1559_v17 = vld [vmem:[%s2445_s3 + $0x90] sm:$0xff]  ;;  %v1560_v18 = vld [vmem:[%s2445_s3 + $0x98] sm:$0xff]  ;;  %v1571_v21 = vld [vmem:[%s2445_s3 + $0xa0] sm:$0xff]  ;;  %vm1433_vm12 = vcmask 785408   ;;  %p1929_p1 = scmp.lt.s32.totalorder %s1486_s25, %s1486_s25 }
  0x12   :  { %1828 = vmatpush3.bf16.msra.mxu0 %v1827_v53  ;;  %v1881_v20 = vpack.c.bf16 %v1560_v18, %v1559_v17  ;;  %v1572_v23 = vld [vmem:[%s2445_s3 + $0xa8] sm:$0xff]  ;;  %v1573_v25 = vld [vmem:[%s2445_s3 + $0xb0] sm:$0xff]  ;;  %v1522_v29 = vld [vmem:[%s2447_s5 + $0x20] sm:$0xff] }
  0x13   :  { %1834 = vmatpush3.bf16.msra.mxu1 %v1833_v26  ;;  %1835 = vmatprep.subr.bf16.mxu0 %v1973_v8  ;;  %v1890_v24 = vpack.c.bf16 %v1572_v23, %v1571_v21  ;;  %v1574_v26 = vld [vmem:[%s2445_s3 + $0xb8] sm:$0xff]  ;;  %v1523_v30 = vld [vmem:[%s2447_s5 + $0x28] sm:$0xff]  ;;  %v1536_v42 = vld [vmem:[%s2447_s5 + $0x40] sm:$0xff] }
  0x14   :  { %1841 = vmatprep.subr.bf16.mxu1 %v1973_v8  ;;  %v1893_v27 = vpack.c.bf16 %v1574_v26, %v1573_v25  ;;  %v1848_v35 = vpack.c.bf16 %v1523_v30, %v1522_v29  ;;  %v1537_v43 = vld [vmem:[%s2447_s5 + $0x48] sm:$0xff]  ;;  %v1538_v50 = vld [vmem:[%s2447_s5 + $0x50] sm:$0xff]  ;;  %v1539_v51 = vld [vmem:[%s2447_s5 + $0x58] sm:$0xff] }
  0x15   :  { %v1860_v48 = vpack.c.bf16 %v1537_v43, %v1536_v42  ;;  %v1550_v53 = vld [vmem:[%s2447_s5 + $0x60] sm:$0xff]  ;;  %v1553_v62 = vld [vmem:[%s2447_s5 + $0x78] sm:$0xff]  ;;  %v1565_v1 = vld [vmem:[%s2447_s5 + $0x88] sm:$0xff] }
  0x16   :  { %v1535_v56 = vld [vmem:[%s2446_s4 + $0x2] ss:$0 sm:$0xff]  ;;  %v1566_v10 = vld [vmem:[%s2447_s5 + $0x90] sm:$0xff]  ;;  %v1567_v11 = vld [vmem:[%s2447_s5 + $0x98] sm:$0xff] }
  0x17   :  { %v1579_v14 = vld [vmem:[%s2447_s5 + $0xa8] sm:$0xff]  ;;  %v1580_v21 = vld [vmem:[%s2447_s5 + $0xb0] sm:$0xff]  ;;  %v1581_v23 = vld [vmem:[%s2447_s5 + $0xb8] sm:$0xff] }
  0x18   :  { %v1577_v26 = vld [vmem:[%s2446_s4 + $0x5] ss:$0 sm:$0xff]  ;;  %v1569_v42 = vld [vmem:[%s2448_s6 + $0x4] ss:$0 sm:$0xff] }
  0xdf   :  { %v130_v34 = vpop.f32.mrb[0].mxu0 }
  0xe0   :  { %v131_v37 = vadd.f32 %v130_v34, %v53_v32  ;;  %v132_v38 = vpop.f32.mrb[1].mxu0  ;;  %v1512_v32 = vld [vmem:[%s2446_s4] ss:$0 sm:$0xff] }
  0xe1   :  { %v2130_v40 = vadd.f32 %v132_v38, %v57_v33  ;;  %v214_v49 = vpop.f32.mrb[0].mxu1  ;;  %v1525_v38 = vld [vmem:[%s2447_s5 + $0x38] sm:$0xff] }
  0xe2   :  { %v135_v39 = vmax.f32 %v131_v37, 0.0  ;;  %v1665_v52 = vpop.f32.mrb[1].mxu1  ;;  %v215_v57 = vadd.f32 %v1508_v54, %v214_v49  ;;  %v1524_v37 = vld [vmem:[%s2447_s5 + $0x30] sm:$0xff]  ;;  %v1551_v54 = vld [vmem:[%s2447_s5 + $0x68] sm:$0xff] }
  0xe3   :  { %v136_v44 = vmax.f32 %v2130_v40, 0.0  ;;  %v1863_v52 = vpack.c.bf16 %v1539_v51, %v1538_v50  ;;  %v1872_v59 = vpack.c.bf16 %v1551_v54, %v1550_v53 }
  0xe4   :  { %857 = vrot.lane.b32.xlu1 %v135_v39, %s1975_s19  ;;  %485 = vrot.lane.b32.xlu0 %v135_v39, %s1976_s1 }
  0xe5   :  { %1686 = vmatmul.mubr.msk.f32.vlgmr.msra.gmra.mrb[2].mxu1 %vm60_vm1, %v135_v39  ;;  %1675 = vmatmul.mubr.msk.f32.vlgmr.msra.gmra.mrb[2].mxu0 %vm60_vm1, %v215_v57 }
  0xe6   :  { %1843 = vmatpush3.bf16.msra.mxu1 %v1842_v41  ;;  %1707 = vmatprep.mubr.msk.f32.mxu1 %vm1974_vm0, %v1972_v7 }
  0xe7   :  { %1844 = vmatprep.subr.bf16.mxu1 %v1973_v8  ;;  %1837 = vmatpush3.bf16.msra.mxu0 %v1836_v58 }
  0xe8   :  { %1228 = vrot.lane.b32.xlu1 %v136_v44, %s1976_s1  ;;  %671 = vrot.lane.b32.xlu0 %v135_v39, %s1977_s20  ;;  %v1851_v39 = vpack.c.bf16 %v1525_v38, %v1524_v37  ;;  %v1555_v37 = vld [vmem:[%s2448_s6 + $0x3] ss:$0 sm:$0xff]  ;;  %s1984_s1 = smov 4  }
  0xe9   :  { %1696 = vmatprep.mubr.msk.f32.mxu0 %vm1974_vm0, %v1972_v7  ;;  %1838 = vmatprep.subr.bf16.mxu0 %v1973_v8 }
  0xea   :  { %1846 = vmatpush3.bf16.msra.mxu1 %v1845_v45  ;;  %v1521_v45 = vld [vmem:[%s2446_s4 + $0x1] ss:$0 sm:$0xff] }
  0xeb   :  { %1853 = vmatprep.subr.bf16.mxu1 %v1973_v8  ;;  %1840 = vmatpush3.bf16.msra.mxu0 %v1839_v61  ;;  %v1552_v61 = vld [vmem:[%s2447_s5 + $0x70] sm:$0xff] }
  0xec   :  { %1847 = vmatprep.subr.bf16.mxu0 %v1973_v8  ;;  %v1875_v63 = vpack.c.bf16 %v1553_v62, %v1552_v61 }
 0x156   :  { %v486_v3 = vpop.permute.xlu0 %485  ;;  %v858_v19 = vpop.permute.xlu1 %857 }
 0x157   :  { %1708 = vmatmul.mubr.msk.f32.vlgmr.msra.gmra.mrb[4].mxu1 %vm60_vm1, %v486_v3  ;;  %v1549_v3 = vld [vmem:[%s2446_s4 + $0x3] ss:$0 sm:$0xff] }
 0x158   :  { %1855 = vmatpush3.bf16.msra.mxu1 %v1854_v0  ;;  %1729 = vmatprep.mubr.msk.f32.mxu1 %vm1974_vm0, %v1972_v7  ;;  %v1564_v0 = vld [vmem:[%s2447_s5 + $0x80] sm:$0xff] }
 0x159   :  { %1856 = vmatprep.subr.bf16.mxu1 %v1973_v8  ;;  %v1884_v6 = vpack.c.bf16 %v1565_v1, %v1564_v0 }
 0x15a   :  { %v672_v12 = vpop.permute.xlu0 %671  ;;  %v1229_v28 = vpop.permute.xlu1 %1228 }
 0x15c   :  { %1858 = vmatpush3.bf16.msra.mxu1 %v1857_v4 }
 0x15d   :  { %1865 = vmatprep.subr.bf16.mxu1 %v1973_v8 }
 0x15f   :  { %1730 = vmatmul.mubr.msk.f32.vlgmr.msra.gmra.mrb[6].mxu1 %vm60_vm1, %v672_v12  ;;  %v1887_v12 = vpack.c.bf16 %v1567_v11, %v1566_v10 }
 0x160   :  { %1867 = vmatpush3.bf16.msra.mxu1 %v1866_v9  ;;  %1751 = vmatprep.mubr.msk.f32.mxu1 %vm1974_vm0, %v1972_v7 }
 0x161   :  { %1868 = vmatprep.subr.bf16.mxu1 %v1973_v8 }
 0x164   :  { %1870 = vmatpush3.bf16.msra.mxu1 %v1869_v13  ;;  %v1578_v13 = vld [vmem:[%s2447_s5 + $0xa0] sm:$0xff] }
 0x165   :  { %1877 = vmatprep.subr.bf16.mxu1 %v1973_v8 }
 0x167   :  { %1752 = vmatmul.mubr.msk.f32.vlgmr.msra.gmra.mrb[8].mxu1 %vm60_vm1, %v858_v19  ;;  %v1896_v19 = vpack.c.bf16 %v1579_v14, %v1578_v13 }
 0x168   :  { %1879 = vmatpush3.bf16.msra.mxu1 %v1878_v16  ;;  %1773 = vmatprep.mubr.msk.f32.mxu1 %vm1974_vm0, %v1972_v7  ;;  %v1563_v16 = vld [vmem:[%s2446_s4 + $0x4] ss:$0 sm:$0xff] }
 0x169   :  { %1880 = vmatprep.subr.bf16.mxu1 %v1973_v8 }
 0x16c   :  { %1882 = vmatpush3.bf16.msra.mxu1 %v1881_v20 }
 0x16d   :  { %1889 = vmatprep.subr.bf16.mxu1 %v1973_v8 }
 0x16f   :  { %1774 = vmatmul.mubr.msk.f32.vlgmr.msra.gmra.mrb[10].mxu1 %vm60_vm1, %v136_v44 }
 0x170   :  { %1891 = vmatpush3.bf16.msra.mxu1 %v1890_v24  ;;  %1795 = vmatprep.mubr.msk.f32.mxu1 %vm1974_vm0, %v1972_v7  ;;  %v1899_v24 = vpack.c.bf16 %v1581_v23, %v1580_v21 }
 0x171   :  { %1892 = vmatprep.subr.bf16.mxu1 %v1973_v8 }
 0x174   :  { %1894 = vmatpush3.bf16.msra.mxu1 %v1893_v27 }
 0x177   :  { %1796 = vmatmul.mubr.msk.f32.vlgmr.msra.gmra.mrb[12].mxu1 %vm60_vm1, %v1229_v28 }
 0x1b8   :  { %v368_v31 = vpop.f32.mrb[2].mxu1  ;;  %v2273_v40 = vpop.f32.mrb[2].mxu0 }
 0x1b9   :  { %v372_v33 = vadd.f32 %v368_v31, %v2101_v22  ;;  %v1687_v34 = vpop.f32.mrb[3].mxu1  ;;  %v1676_v41 = vpop.f32.mrb[3].mxu0 }
 0x1bb   :  { %v380_v36 = vadd.f32 %v1512_v32, %v372_v33 }
 0x1bd   :  { %1697 = vmatmul.mubr.msk.f32.vlgmr.msra.gmra.mrb[4].mxu0 %vm60_vm1, %v380_v36 }
 0x1be   :  { %1849 = vmatpush3.bf16.msra.mxu0 %v1848_v35  ;;  %1718 = vmatprep.mubr.msk.f32.mxu0 %vm1974_vm0, %v1972_v7 }
 0x1bf   :  { %1850 = vmatprep.subr.bf16.mxu0 %v1973_v8 }
 0x1c2   :  { %1852 = vmatpush3.bf16.msra.mxu0 %v1851_v39 }
 0x1c3   :  { %1859 = vmatprep.subr.bf16.mxu0 %v1973_v8 }
 0x22a   :  { %v555_v44 = vpop.f32.mrb[4].mxu1 }
 0x22b   :  { %v559_v46 = vadd.f32 %v555_v44, %v2101_v22  ;;  %v1709_v47 = vpop.f32.mrb[5].mxu1 }
 0x22d   :  { %v568_v49 = vadd.f32 %v1521_v45, %v559_v46  ;;  %v1513_v46 = vld [vmem:[%s2448_s6] ss:$0 sm:$0xff] }
 0x22f   :  { %1719 = vmatmul.mubr.msk.f32.vlgmr.msra.gmra.mrb[6].mxu0 %vm60_vm1, %v568_v49 }
 0x230   :  { %1861 = vmatpush3.bf16.msra.mxu0 %v1860_v48  ;;  %1740 = vmatprep.mubr.msk.f32.mxu0 %vm1974_vm0, %v1972_v7  ;;  %v1583_v48 = vld [vmem:[%s2448_s6 + $0x5] ss:$0 sm:$0xff] }
 0x231   :  { %1862 = vmatprep.subr.bf16.mxu0 %v1973_v8 }
 0x232   :  { %v741_v55 = vpop.f32.mrb[6].mxu1 }
 0x233   :  { %v745_v57 = vadd.f32 %v741_v55, %v2101_v22  ;;  %v1731_v58 = vpop.f32.mrb[7].mxu1 }
 0x234   :  { %1864 = vmatpush3.bf16.msra.mxu0 %v1863_v52 }
 0x235   :  { %v754_v60 = vadd.f32 %v1535_v56, %v745_v57  ;;  %1871 = vmatprep.subr.bf16.mxu0 %v1973_v8 }
 0x237   :  { %1741 = vmatmul.mubr.msk.f32.vlgmr.msra.gmra.mrb[8].mxu0 %vm60_vm1, %v754_v60 }
 0x238   :  { %1873 = vmatpush3.bf16.msra.mxu0 %v1872_v59  ;;  %1762 = vmatprep.mubr.msk.f32.mxu0 %vm1974_vm0, %v1972_v7 }
 0x239   :  { %1874 = vmatprep.subr.bf16.mxu0 %v1973_v8 }
 0x23a   :  { %v927_v2 = vpop.f32.mrb[8].mxu1 }
 0x23b   :  { %v931_v4 = vadd.f32 %v927_v2, %v2101_v22  ;;  %v1753_v5 = vpop.f32.mrb[9].mxu1 }
 0x23c   :  { %1876 = vmatpush3.bf16.msra.mxu0 %v1875_v63 }
 0x23d   :  { %v940_v9 = vadd.f32 %v1549_v3, %v931_v4  ;;  %1883 = vmatprep.subr.bf16.mxu0 %v1973_v8 }
 0x23f   :  { %1763 = vmatmul.mubr.msk.f32.vlgmr.msra.gmra.mrb[10].mxu0 %vm60_vm1, %v940_v9 }
 0x240   :  { %1885 = vmatpush3.bf16.msra.mxu0 %v1884_v6  ;;  %1784 = vmatprep.mubr.msk.f32.mxu0 %vm1974_vm0, %v1972_v7 }
 0x241   :  { %1886 = vmatprep.subr.bf16.mxu0 %v1973_v8 }
 0x242   :  { %v1112_v15 = vpop.f32.mrb[10].mxu1 }
 0x243   :  { %v1116_v17 = vadd.f32 %v1112_v15, %v2101_v22  ;;  %v1775_v18 = vpop.f32.mrb[11].mxu1 }
 0x244   :  { %1888 = vmatpush3.bf16.msra.mxu0 %v1887_v12 }
 0x245   :  { %v1125_v20 = vadd.f32 %v1563_v16, %v1116_v17  ;;  %1895 = vmatprep.subr.bf16.mxu0 %v1973_v8 }
 0x247   :  { %1785 = vmatmul.mubr.msk.f32.vlgmr.msra.gmra.mrb[12].mxu0 %vm60_vm1, %v1125_v20 }
 0x248   :  { %1897 = vmatpush3.bf16.msra.mxu0 %v1896_v19  ;;  %1806 = vmatprep.mubr.msk.f32.mxu0 %vm1974_vm0, %v1972_v7  ;;  %v1527_v7 = vld [vmem:[%s2448_s6 + $0x1] ss:$0 sm:$0xff] }
 0x249   :  { %1898 = vmatprep.subr.bf16.mxu0 %v1973_v8 }
 0x24a   :  { %v1298_v25 = vpop.f32.mrb[12].mxu1 }
 0x24b   :  { %v1302_v27 = vadd.f32 %v1298_v25, %v2101_v22  ;;  %v1797_v28 = vpop.f32.mrb[13].mxu1  ;;  %v1541_v22 = vld [vmem:[%s2448_s6 + $0x2] ss:$0 sm:$0xff]  ;;  %s1981_s6 = smov 1  }
 0x24c   :  { %1900 = vmatpush3.bf16.msra.mxu0 %v1899_v24 }
 0x24d   :  { %v1311_v29 = vadd.f32 %v1577_v26, %v1302_v27 }
 0x24f   :  { %1807 = vmatmul.mubr.msk.f32.vlgmr.msra.gmra.mrb[14].mxu0 %vm60_vm1, %v1311_v29 }
 0x290   :  { %v461_v30 = vpop.f32.mrb[4].mxu0 }
 0x291   :  { %v1698_v31 = vpop.f32.mrb[5].mxu0  ;;  %v2390_v47 = vadd.f32 %v1513_v46, %v461_v30 }
 0x302   :  { %v651_v32 = vpop.f32.mrb[6].mxu0 }
 0x303   :  { %v2366_v8 = vadd.f32 %v1527_v7, %v651_v32  ;;  %v1720_v33 = vpop.f32.mrb[7].mxu0 }
 0x305   :  { %656 = vrot.lane.b32.xlu0 %v2366_v8, %s1978_s27 }
 0x30a   :  { %v837_v34 = vpop.f32.mrb[8].mxu0 }
 0x30b   :  { %v2372_v35 = vadd.f32 %v1541_v22, %v837_v34  ;;  %v1742_v36 = vpop.f32.mrb[9].mxu0 }
 0x30d   :  { %842 = vrot.lane.b32.xlu1 %v2372_v35, %s1978_s27 }
 0x312   :  { %v1023_v38 = vpop.f32.mrb[10].mxu0 }
 0x313   :  { %v2378_v39 = vadd.f32 %v1555_v37, %v1023_v38  ;;  %v1764_v41 = vpop.f32.mrb[11].mxu0 }
 0x315   :  { %1028 = vrot.lane.b32.xlu0 %v2378_v39, %s1978_s27 }
 0x31a   :  { %v1208_v43 = vpop.f32.mrb[12].mxu0 }
 0x31b   :  { %v2384_v44 = vadd.f32 %v1569_v42, %v1208_v43  ;;  %v1786_v45 = vpop.f32.mrb[13].mxu0 }
 0x31d   :  { %1213 = vrot.lane.b32.xlu1 %v2384_v44, %s1978_s27 }
 0x321   :  { %466 = vrot.lane.b32.xlu1 %v2390_v47, %s1978_s27 }
 0x322   :  { %v1394_v49 = vpop.f32.mrb[14].mxu0 }
 0x323   :  { %v2396_v50 = vadd.f32 %v1583_v48, %v1394_v49  ;;  %v1808_v51 = vpop.f32.mrb[15].mxu0 }
 0x325   :  { %1399 = vrot.lane.b32.xlu0 %v2396_v50, %s1978_s27 }
 0x329   :  { %476 = vrot.lane.b32.xlu0 %v2273_v40, %s1979_s16 }
 0x377   :  { %v657_v52 = vpop.permute.xlu0 %656 }
 0x378   :  { %v659_v53 = vmul.f32 %v657_v52, %v2273_v40 }
 0x37a   :  { %661 = vrot.lane.b32.xlu0 %v659_v53, %s1980_s2 }
 0x37f   :  { %v843_v54 = vpop.permute.xlu1 %842 }
 0x380   :  { %v845_v55 = vmul.f32 %v843_v54, %v2273_v40 }
 0x382   :  { %847 = vrot.lane.b32.xlu1 %v845_v55, %s1980_s2 }
 0x387   :  { %v1029_v56 = vpop.permute.xlu0 %1028 }
 0x388   :  { %v1031_v57 = vmul.f32 %v1029_v56, %v2273_v40 }
 0x38a   :  { %1033 = vrot.lane.b32.xlu1 %v1031_v57, %s1980_s2 }
 0x38f   :  { %v1214_v58 = vpop.permute.xlu1 %1213 }
 0x390   :  { %v1216_v59 = vmul.f32 %v1214_v58, %v2273_v40 }
 0x392   :  { %1218 = vrot.lane.b32.xlu0 %v1216_v59, %s1980_s2 }
 0x393   :  { %v467_v60 = vpop.permute.xlu1 %466 }
 0x394   :  { %v469_v61 = vmul.f32 %v467_v60, %v2273_v40 }
 0x396   :  { %471 = vrot.lane.b32.xlu0 %v469_v61, %s1980_s2 }
 0x397   :  { %v1400_v62 = vpop.permute.xlu0 %1399 }
 0x398   :  { %v1402_v63 = vmul.f32 %v1400_v62, %v2273_v40 }
 0x39a   :  { %1404 = vrot.lane.b32.xlu1 %v1402_v63, %s1980_s2 }
 0x39b   :  { %v477_v0 = vpop.permute.xlu0 %476 }
 0x3ec   :  { %v662_v1 = vpop.permute.xlu0 %661 }
 0x3ed   :  { %v664_v2 = vadd.f32 %v662_v1, %v659_v53 }
 0x3ef   :  { %v665_v3 = vadd.f32 %v664_v2, %v477_v0 }
 0x3f1   :  { %1436 = vrot.lane.b32.xlu1 %v665_v3, %s1981_s6 }
 0x3f4   :  { %v848_v4 = vpop.permute.xlu1 %847 }
 0x3f5   :  { %v850_v5 = vadd.f32 %v848_v4, %v845_v55 }
 0x3f7   :  { %v851_v6 = vadd.f32 %v850_v5, %v477_v0 }
 0x3f9   :  { %1440 = vrot.lane.b32.xlu0 %v851_v6, %s1982_s17 }
 0x3fc   :  { %v1034_v9 = vpop.permute.xlu1 %1033 }
 0x3fd   :  { %v1036_v10 = vadd.f32 %v1034_v9, %v1031_v57 }
 0x3ff   :  { %v1037_v11 = vadd.f32 %v1036_v10, %v477_v0 }
 0x401   :  { %1444 = vrot.lane.b32.xlu1 %v1037_v11, %s1983_s18 }
 0x404   :  { %v1219_v12 = vpop.permute.xlu0 %1218 }
 0x405   :  { %v1221_v13 = vadd.f32 %v1219_v12, %v1216_v59 }
 0x407   :  { %v1222_v40 = vadd.f32 %v1221_v13, %v477_v0 }
 0x408   :  { %v472_v17 = vpop.permute.xlu0 %471 }
 0x409   :  { %1448 = vrot.lane.b32.xlu0 %v1222_v40, %s1984_s1  ;;  %v474_v18 = vadd.f32 %v472_v17, %v469_v61 }
 0x40b   :  { %v479_v21 = vadd.f32 %v477_v0, %v474_v18 }
 0x40c   :  { %v1405_v14 = vpop.permute.xlu1 %1404 }
 0x40d   :  { %v1407_v15 = vadd.f32 %v1405_v14, %v1402_v63 }
 0x40f   :  { %v1408_v16 = vadd.f32 %v1407_v15, %v477_v0 }
 0x411   :  { %1452 = vrot.lane.b32.xlu1 %v1408_v16, %s1985_s21 }
 0x415   :  { %1412 = vrot.lane.b32.xlu1 %v2372_v35, %s1975_s19  ;;  %s1986_s19 = smov 16  }
 0x463   :  { %v1437_v19 = vpop.permute.xlu1 %1436 }
 0x464   :  { %v1456_v24 = vsel %vm1455_vm2, %v479_v21, %v1437_v19 }
 0x46b   :  { %v1441_v20 = vpop.permute.xlu0 %1440 }
 0x46c   :  { %v1458_v26 = vsel %vm1457_vm3, %v1456_v24, %v1441_v20 }
 0x473   :  { %v1445_v23 = vpop.permute.xlu1 %1444 }
 0x474   :  { %v1460_v27 = vsel %vm1459_vm4, %v1458_v26, %v1445_v23 }
 0x47b   :  { %v1449_v25 = vpop.permute.xlu0 %1448 }
 0x47c   :  { %v1462_v28 = vsel %vm1461_vm5, %v1460_v27, %v1449_v25 }
 0x483   :  { %v1453_v29 = vpop.permute.xlu1 %1452 }
 0x484   :  { %v1464_v30 = vsel %vm1463_vm6, %v1462_v28, %v1453_v29 }
 0x485   :  { %v1465_v31 = vmul.f32 0.17677669, %v1464_v30 }
 0x487   :  { %v1467_v7 = vsel %vm1466_vm7, %v1465_v31, -inf  ;;  %v1413_v37 = vpop.permute.xlu1 %1412 }
 0x488   :  { %1468 = vmax.xlane.f32.xlu0 %v1467_v7 }
 0x49e   :  { %1409 = vrot.lane.b32.xlu0 %v2366_v8, %s1986_s19 }
 0x4a2   :  { %1415 = vrot.lane.b32.xlu0 %v2378_v39, %s1987_s22 }
 0x4a6   :  { %1421 = vrot.lane.b32.xlu0 %v2396_v50, %s1988_s23 }
 0x515   :  { %v1469_v32 = vpop.xlane.xlu0 %1468 }
 0x516   :  { %v1470_v33 = vsub.f32 %v1465_v31, %v1469_v32 }
 0x518   :  { %v1471_v22 = vmul.f32 1.442695, %v1470_v33 }
 0x519   :  { %v1410_v36 = vpop.permute.xlu0 %1409 }
 0x51a   :  { %1920 = vpow2.f32 %v1471_v22  ;;  %v1425_v38 = vsel %vm1424_vm8, %v2390_v47, %v1410_v36 }
 0x51b   :  { %v1426_v41 = vsel %vm60_vm1, %v1425_v38, %v1413_v37 }
 0x51d   :  { %v1416_v8 = vpop.permute.xlu0 %1415 }
 0x51e   :  { %v1428_v42 = vsel %vm1427_vm9, %v1426_v41, %v1416_v8 }
 0x521   :  { %v1422_v45 = vpop.permute.xlu0 %1421 }
 0x524   :  { %v1921_v34 = vpop.eup %1920 }
 0x525   :  { %v1473_v35 = vsel %vm1466_vm7, %v1921_v34, 0.0 }
 0x526   :  { %1474 = vadd.xlane.f32.xlu1 %v1473_v35 }
 0x537   :  { %1418 = vrot.lane.b32.xlu1 %v2384_v44, %s1977_s20  ;;  %s1924_s20 = scalar_lea.vmem %s1486_s25, 128 }
 0x538   :  { %p1925_p0 = scmp.ne.s32.totalorder %s1486_s25, %s1924_s20  ;;  %p1930_p2 = scmp.lt.s32.totalorder %s1924_s20, %s1924_s20 }
 0x53a   :  { %p1931_p3 = por %p1930_p2, %p1929_p1 }
 0x53c   :  { %p1932_p4 = pnand %p1931_p3, %p1925_p0 }
 0x5b3   :  { %v1475_v39 = vpop.xlane.xlu1 %1474 }
 0x5b4   :  { %1922 = vrcp.f32 %v1475_v39 }
 0x5b7   :  { %v1419_v43 = vpop.permute.xlu1 %1418 }
 0x5b8   :  { %v1430_v44 = vsel %vm1429_vm10, %v1428_v42, %v1419_v43 }
 0x5b9   :  { %v1432_v46 = vsel %vm1431_vm11, %v1430_v44, %v1422_v45 }
 0x5ba   :  { %1434 = vst.msk [vmem:[#allocation2] sm:$0xff] %vm1433_vm12, %v1432_v46 }
 0x5bb   :  { %1935 = shalt.err (!%p1932_p4)
}
 0x5bc   :  { %s1936_s0 = scalar_lea.hbm %s2452_s10, 128 }
 0x5bd   :  { %p1937_p5 = scmp.ne.s32.totalorder %s2452_s10, %s1936_s0  ;;  %p1940_p6 = scmp.lt.u32.totalorder %s1936_s0, %s2452_s10 }
 0x5bf   :  { %p1942_p7 = pnand %p1940_p6, %p1937_p5 }
 0x5c1   :  { %1945 = shalt.err (!%p1942_p7)
}
 0x5c2   :  { %1488 = dma.vmem_to_hbm [thread:$0]  %s1486_s25, 128, %s2452_s10, [#allocation3]   ;;  %v1923_v47 = vpop.eup %1922 }
 0x5c3   :  { %s1990_s30 = smov [#allocation4]   ;;  %v1477_v48 = vmul.f32 %v1923_v47, %v1921_v34 }
 0x5c4   :  { %s1495_s12 = sshll.u32 %s1990_s30, 4  ;;  %s1496_s12 = int_to_ptr.vmem [resolvable:$true] %s1495_s12 }
 0x5c5   :  { %1478 = vst.msk [vmem:[#allocation4] sm:$0xff] %vm1466_vm7, %v1477_v48  ;;  %s1946_s13 = scalar_lea.vmem %s1496_s12, 128  ;;  %p1951_p9 = scmp.lt.s32.totalorder %s1496_s12, %s1496_s12 }
 0x5c6   :  { %p1947_p8 = scmp.ne.s32.totalorder %s1496_s12, %s1946_s13  ;;  %p1952_p10 = scmp.lt.s32.totalorder %s1946_s13, %s1946_s13 }
 0x5c8   :  { %p1953_p11 = por %p1952_p10, %p1951_p9 }
 0x5ca   :  { %p1954_p12 = pnand %p1953_p11, %p1947_p8 }
 0x5cc   :  { %1957 = shalt.err (!%p1954_p12)
}
 0x5cd   :  { %s1958_s14 = scalar_lea.hbm %s2453_s11, 128 }
 0x5ce   :  { %p1959_p13 = scmp.ne.s32.totalorder %s2453_s11, %s1958_s14  ;;  %p1962_p0 = scmp.lt.u32.totalorder %s1958_s14, %s2453_s11 }
 0x5d0   :  { %p1964_p1 = pnand %p1962_p0, %p1959_p13 }
 0x5d2   :  { %1967 = shalt.err (!%p1964_p1)
}
 0x5d3   :  { %1498 = dma.vmem_to_hbm [thread:$0]  %s1496_s12, 128, %s2453_s11, [#allocation5]  }
 0x5d4   :  { %1968 = dma.done.wait [#allocation3], 128  }
 0x5d5   :  { %1969 = vsyncadd [#allocation3], 4294967168 }
 0x5d6   :  { %1970 = dma.done.wait [#allocation5], 128  }
 0x5d7   :  { %1971 = vsyncadd [#allocation5], 4294967168 }
 0x5d8   :  { %1505 = vsyncpa [#allocation3], 1 }
 0x5d9   :  { %1506 = vsyncpa [#allocation5], 1 }

</bundles_post_ra>
